<compile_context>
chip_gen: v7x
topology: tpu7x:2x2x1
jax: 0.10.0
libtpu: 0.0.40
codegen_flags: <defaults>
</compile_context>

<pallas_src>
import jax
import jax.numpy as jnp
from jax.experimental import pallas as pl
from jax.experimental.pallas import tpu as pltpu


def fnn_kernel(x_ref, w1_ref, b1_ref, w2_ref, b2_ref, w3_ref, b3_ref, o_ref):
    # fc1 + relu : bf16 x bf16 on the MXU, f32 accumulation.
    h1 = jnp.dot(x_ref[...], w1_ref[...], preferred_element_type=jnp.float32)
    h1 = jnp.maximum(h1 + b1_ref[...], 0.0)

    # fc2 + relu : cast activations back to bf16 for the MXU, accumulate in f32.
    h2 = jnp.dot(h1.astype(jnp.bfloat16), w2_ref[...],
                 preferred_element_type=jnp.float32)
    h2 = jnp.maximum(h2 + b2_ref[...], 0.0)

    # fc3 (out_features == 1): VPU multiply + lane reduction instead of an N=1
    # MXU matmul; bias comes from SMEM as a scalar.
    z = jnp.sum(h2 * w3_ref[...], axis=-1, keepdims=True) + b3_ref[0]

    # sigmoid, broadcast across lanes so the store is lane-dense (128 wide).
    o_ref[...] = jnp.broadcast_to(jax.nn.sigmoid(z), o_ref.shape).astype(o_ref.dtype)


def fnn_forward(x, w1, b1, w2, b2, w3, b3):
    """x: (B, in_dim) f32. Weights stored as (in_features, out_features)."""
    B, in_dim = x.shape
    hid = w1.shape[1]

    # Batch tiling: one tile here (B is small), but the structure pipelines and
    # keeps weights VMEM-resident if B grows.
    tb = B if B <= 512 else 512
    assert B % tb == 0, "batch must be divisible by the batch tile"
    grid = (B // tb,)

    # Compress the DMA-dominant operands to bf16 (MXU-native on v5e/v6e/v7x).
    x_bf = x.astype(jnp.bfloat16)
    w1_bf = w1.astype(jnp.bfloat16)
    w2_bf = w2.astype(jnp.bfloat16)
    w3_row = w3.reshape(1, hid)          # (hid, 1) -> (1, hid) row for VPU reduction
    b3_s = b3.reshape(1)                 # scalar, lives in SMEM

    bytes_accessed = (
        x_bf.size * 2 + w1_bf.size * 2 + w2_bf.size * 2
        + b1.size * 4 + b2.size * 4 + w3_row.size * 4 + 4
        + B * 128 * 4
    )
    cost = pl.CostEstimate(
        flops=2 * B * (in_dim * hid + hid * hid + hid),
        transcendentals=B,
        bytes_accessed=bytes_accessed,
    )

    out_padded = pl.pallas_call(
        fnn_kernel,
        out_shape=jax.ShapeDtypeStruct((B, 128), jnp.float32),
        grid=grid,
        in_specs=[
            pl.BlockSpec((tb, in_dim), lambda i: (i, 0)),          # x tile
            pl.BlockSpec((in_dim, hid), lambda i: (0, 0)),         # w1 (resident)
            pl.BlockSpec((1, hid), lambda i: (0, 0)),              # b1
            pl.BlockSpec((hid, hid), lambda i: (0, 0)),            # w2 (resident)
            pl.BlockSpec((1, hid), lambda i: (0, 0)),              # b2
            pl.BlockSpec((1, hid), lambda i: (0, 0)),              # w3 row
            pl.BlockSpec(memory_space=pltpu.MemorySpace.SMEM),     # b3 scalar
        ],
        out_specs=pl.BlockSpec((tb, 128), lambda i: (i, 0)),
        compiler_params=pltpu.CompilerParams(
            dimension_semantics=("parallel",),
        ),
        cost_estimate=cost,
    )(x_bf, w1_bf, b1, w2_bf, b2, w3_row, b3_s)

    return out_padded[:, :1]


def init_params(key, in_dim, hid_dim):
    """Deterministic init mimicking nn.Linear default (uniform +- 1/sqrt(fan_in))."""
    ks = jax.random.split(key, 6)

    def lin(kw, kb, fan_in, fan_out):
        bound = 1.0 / jnp.sqrt(fan_in)
        w = jax.random.uniform(kw, (fan_in, fan_out), jnp.float32, -bound, bound)
        b = jax.random.uniform(kb, (1, fan_out), jnp.float32, -bound, bound)
        return w, b

    w1, b1 = lin(ks[0], ks[1], in_dim, hid_dim)
    w2, b2 = lin(ks[2], ks[3], hid_dim, hid_dim)
    w3, b3 = lin(ks[4], ks[5], hid_dim, 1)
    return w1, b1, w2, b2, w3, b3


if __name__ == "__main__":
    in_dim, hid_dim, batch = 1024, 256, 8

    key = jax.random.PRNGKey(0)
    kx, kp = jax.random.split(key)
    x = jax.random.normal(kx, (batch, in_dim), jnp.float32)
    params = init_params(kp, in_dim, hid_dim)

    out = fnn_forward(x, *params)
    out = jax.block_until_ready(out)
    assert out.shape == (batch, 1)

    w1, b1, w2, b2, w3, b3 = params

    # Reference with the same bf16 operand compression (validates the kernel math).
    xb = x.astype(jnp.bfloat16)
    h = jnp.maximum(jnp.dot(xb, w1.astype(jnp.bfloat16),
                            preferred_element_type=jnp.float32) + b1, 0.0)
    h = jnp.maximum(jnp.dot(h.astype(jnp.bfloat16), w2.astype(jnp.bfloat16),
                            preferred_element_type=jnp.float32) + b2, 0.0)
    ref_bf = jax.nn.sigmoid(jnp.sum(h * w3.reshape(1, -1), axis=-1, keepdims=True)
                            + b3.reshape(1, 1))
    assert jnp.allclose(out, ref_bf, atol=2e-3, rtol=2e-3), "mismatch vs bf16 reference"

    # Full-f32 reference (module semantics); loose tolerance covers bf16 quantization.
    h32 = jnp.maximum(x @ w1 + b1, 0.0)
    h32 = jnp.maximum(h32 @ w2 + b2, 0.0)
    ref_f32 = jax.nn.sigmoid(h32 @ w3 + b3)
    assert jnp.allclose(out, ref_f32, atol=0.1), "mismatch vs f32 reference"

    print("KERNEL_OK")
</pallas_src>

<mosaic_0001>
module attributes {stable_mosaic.version = 11 : i64} {
  func.func @fnn_kernel(%arg0: i32, %arg1: memref<8x1024xbf16, #tpu.memory_space<vmem>>, %arg2: memref<1024x256xbf16, #tpu.memory_space<vmem>>, %arg3: memref<1x256xf32, #tpu.memory_space<vmem>>, %arg4: memref<256x256xbf16, #tpu.memory_space<vmem>>, %arg5: memref<1x256xf32, #tpu.memory_space<vmem>>, %arg6: memref<1x256xf32, #tpu.memory_space<vmem>>, %arg7: memref<1xf32, #tpu.memory_space<smem>>, %arg8: memref<8x128xf32, #tpu.memory_space<vmem>>) attributes {dimension_semantics = [#tpu.dimension_semantics<parallel>], iteration_bounds = array<i64: 1>, scalar_prefetch = 0 : i64, scratch_operands = 0 : i64, tpu.core_type = #tpu.core_type<tc>, window_params = [{transform_indices = @transform_0, window_bounds = array<i64: 8, 1024>}, {pipeline_mode = #tpu.pipeline_mode<synchronous>, transform_indices = @transform_1, window_bounds = array<i64: 1024, 256>}, {pipeline_mode = #tpu.pipeline_mode<synchronous>, transform_indices = @transform_2, window_bounds = array<i64: 1, 256>}, {pipeline_mode = #tpu.pipeline_mode<synchronous>, transform_indices = @transform_3, window_bounds = array<i64: 256, 256>}, {pipeline_mode = #tpu.pipeline_mode<synchronous>, transform_indices = @transform_4, window_bounds = array<i64: 1, 256>}, {pipeline_mode = #tpu.pipeline_mode<synchronous>, transform_indices = @transform_5, window_bounds = array<i64: 1, 256>}, {transform_indices = @transform_6, window_bounds = array<i64: 1>}, {transform_indices = @transform_7, window_bounds = array<i64: 8, 128>}]} {
    %c0 = arith.constant 0 : index
    %c0_0 = arith.constant 0 : index
    %0 = vector.load %arg1[%c0, %c0_0] : memref<8x1024xbf16, #tpu.memory_space<vmem>>, vector<8x1024xbf16>
    %c0_1 = arith.constant 0 : index
    %c0_2 = arith.constant 0 : index
    %1 = vector.load %arg2[%c0_1, %c0_2] : memref<1024x256xbf16, #tpu.memory_space<vmem>>, vector<1024x256xbf16>
    %cst = arith.constant dense<0.000000e+00> : vector<8x256xf32>
    %2 = tpu.matmul %0, %1, %cst {dimension_numbers = #tpu.dot_dimension_numbers<[1], [0], [0], [1], [0, 0, 1, 1], [], []>} : vector<8x1024xbf16>, vector<1024x256xbf16>, vector<8x256xf32> -> vector<8x256xf32>
    %c0_3 = arith.constant 0 : index
    %c0_4 = arith.constant 0 : index
    %3 = vector.load %arg3[%c0_3, %c0_4] : memref<1x256xf32, #tpu.memory_space<vmem>>, vector<1x256xf32>
    %4 = vector.broadcast %3 : vector<1x256xf32> to vector<8x256xf32>
    %5 = arith.addf %2, %4 : vector<8x256xf32>
    %cst_5 = arith.constant 0.000000e+00 : f32
    %6 = vector.broadcast %cst_5 : f32 to vector<8x256xf32>
    %7 = arith.maximumf %5, %6 : vector<8x256xf32>
    %8 = arith.truncf %7 : vector<8x256xf32> to vector<8x256xbf16>
    %c0_6 = arith.constant 0 : index
    %c0_7 = arith.constant 0 : index
    %9 = vector.load %arg4[%c0_6, %c0_7] : memref<256x256xbf16, #tpu.memory_space<vmem>>, vector<256x256xbf16>
    %cst_8 = arith.constant dense<0.000000e+00> : vector<8x256xf32>
    %10 = tpu.matmul %8, %9, %cst_8 {dimension_numbers = #tpu.dot_dimension_numbers<[1], [0], [0], [1], [0, 0, 1, 1], [], []>} : vector<8x256xbf16>, vector<256x256xbf16>, vector<8x256xf32> -> vector<8x256xf32>
    %c0_9 = arith.constant 0 : index
    %c0_10 = arith.constant 0 : index
    %11 = vector.load %arg5[%c0_9, %c0_10] : memref<1x256xf32, #tpu.memory_space<vmem>>, vector<1x256xf32>
    %12 = vector.broadcast %11 : vector<1x256xf32> to vector<8x256xf32>
    %13 = arith.addf %10, %12 : vector<8x256xf32>
    %cst_11 = arith.constant 0.000000e+00 : f32
    %14 = vector.broadcast %cst_11 : f32 to vector<8x256xf32>
    %15 = arith.maximumf %13, %14 : vector<8x256xf32>
    %c0_12 = arith.constant 0 : index
    %c0_13 = arith.constant 0 : index
    %16 = vector.load %arg6[%c0_12, %c0_13] : memref<1x256xf32, #tpu.memory_space<vmem>>, vector<1x256xf32>
    %17 = vector.broadcast %16 : vector<1x256xf32> to vector<8x256xf32>
    %18 = arith.mulf %15, %17 : vector<8x256xf32>
    %cst_14 = arith.constant dense<0.000000e+00> : vector<8xf32>
    %19 = vector.multi_reduction <add>, %18, %cst_14 [1] : vector<8x256xf32> to vector<8xf32>
    %20 = vector.shape_cast %19 : vector<8xf32> to vector<8x1xf32>
    %c0_15 = arith.constant 0 : index
    %21 = memref.load %arg7[%c0_15] : memref<1xf32, #tpu.memory_space<smem>>
    %22 = vector.broadcast %21 : f32 to vector<8x1xf32>
    %23 = arith.addf %20, %22 : vector<8x1xf32>
    %24 = arith.negf %23 : vector<8x1xf32>
    %25 = math.exp %24 : vector<8x1xf32>
    %cst_16 = arith.constant 1.000000e+00 : f32
    %26 = vector.broadcast %cst_16 : f32 to vector<8x1xf32>
    %27 = arith.addf %26, %25 : vector<8x1xf32>
    %28 = arith.divf %26, %27 : vector<8x1xf32>
    %29 = vector.shape_cast %28 : vector<8x1xf32> to vector<8x1xf32>
    %30 = vector.broadcast %29 : vector<8x1xf32> to vector<8x128xf32>
    %c0_17 = arith.constant 0 : index
    %c0_18 = arith.constant 0 : index
    %31 = vector.load %arg8[%c0_17, %c0_18] : memref<8x128xf32, #tpu.memory_space<vmem>>, vector<8x128xf32>
    tpu.vector_store %arg8[%c0_17, %c0_18], %30 {strides = array<i32>} : memref<8x128xf32, #tpu.memory_space<vmem>>, vector<8x128xf32>,
    return
  }
  func.func @transform_0(%arg0: i32) -> (i32, i32) {
    %c0_i32 = arith.constant 0 : i32
    %c0_i32_0 = arith.constant 0 : i32
    return %arg0, %c0_i32 : i32, i32
  }
  func.func @transform_1(%arg0: i32) -> (i32, i32) {
    %c0_i32 = arith.constant 0 : i32
    %c0_i32_0 = arith.constant 0 : i32
    %c0_i32_1 = arith.constant 0 : i32
    return %c0_i32, %c0_i32_0 : i32, i32
  }
  func.func @transform_2(%arg0: i32) -> (i32, i32) {
    %c0_i32 = arith.constant 0 : i32
    %c0_i32_0 = arith.constant 0 : i32
    %c0_i32_1 = arith.constant 0 : i32
    return %c0_i32, %c0_i32_0 : i32, i32
  }
  func.func @transform_3(%arg0: i32) -> (i32, i32) {
    %c0_i32 = arith.constant 0 : i32
    %c0_i32_0 = arith.constant 0 : i32
    %c0_i32_1 = arith.constant 0 : i32
    return %c0_i32, %c0_i32_0 : i32, i32
  }
  func.func @transform_4(%arg0: i32) -> (i32, i32) {
    %c0_i32 = arith.constant 0 : i32
    %c0_i32_0 = arith.constant 0 : i32
    %c0_i32_1 = arith.constant 0 : i32
    return %c0_i32, %c0_i32_0 : i32, i32
  }
  func.func @transform_5(%arg0: i32) -> (i32, i32) {
    %c0_i32 = arith.constant 0 : i32
    %c0_i32_0 = arith.constant 0 : i32
    %c0_i32_1 = arith.constant 0 : i32
    return %c0_i32, %c0_i32_0 : i32, i32
  }
  func.func @transform_6(%arg0: i32) -> i32 {
    %c0_i32 = arith.constant 0 : i32
    %c0_i32_0 = arith.constant 0 : i32
    return %c0_i32 : i32
  }
  func.func @transform_7(%arg0: i32) -> (i32, i32) {
    %c0_i32 = arith.constant 0 : i32
    %c0_i32_0 = arith.constant 0 : i32
    return %arg0, %c0_i32 : i32, i32
  }
}

</mosaic_0001>

<bundles_post_ra>
// kernel: tpu_custom_call.1
= control target key start
LH: loop header
LB: loop body
LE: loop exit
PB: predicated region body
PF: predicated region fallthrough
CT: control target
= control target key end

     0   :  { %13 = vsyncpa [#allocation4], 0  ;;  %s2000_s0 = inlined_call_operand.hbm [shape: bf16[8,1024], index: 0, kind: input, shape index: {}]   ;;  %s2001_s1 = inlined_call_operand.hbm [shape: bf16[1024,256], index: 1, kind: input, shape index: {}]   ;;  %s2002_s2 = inlined_call_operand.vmem [shape: f32[1,256], index: 2, kind: input, shape index: {}]   ;;  %s2003_s3 = inlined_call_operand.hbm [shape: bf16[256,256], index: 3, kind: input, shape index: {}]   ;;  %s2004_s4 = inlined_call_operand.vmem [shape: f32[1,256], index: 4, kind: input, shape index: {}]   ;;  %s2005_s5 = inlined_call_operand.vmem [shape: f32[1,256], index: 5, kind: input, shape index: {}]   ;;  %s2006_s6 = inlined_call_operand.<no memory space> [shape: f32[1], index: 6, kind: input, shape index: {}]   ;;  %s2007_s7 = inlined_call_operand.hbm [shape: f32[8,128], index: 7, kind: output, shape index: {}]  }
   0x1   :  { %14 = vsyncpa [#allocation7], 0 }
   0x2   :  { %15 = vsyncpa [#allocation5], 0  ;;  %s1870_s24 = smov [#allocation6]   ;;  %s1776_s28 = scalar_lea.hbm %s2001_s1, 16384 }
   0x3   :  { %s31_s25 = sshll.u32 %s1870_s24, 4  ;;  %p1777_p0 = scmp.ne.s32.totalorder %s2001_s1, %s1776_s28  ;;  %s32_s25 = int_to_ptr.vmem [resolvable:$true] %s31_s25 }
   0x4   :  { %p1780_p1 = scmp.lt.u32.totalorder %s1776_s28, %s2001_s1 }
   0x6   :  { %p1782_p2 = pnand %p1780_p1, %p1777_p0 }
   0x8   :  { %1785 = shalt.err (!%p1782_p2)
}
   0x9   :  { %s1786_s10 = scalar_lea.vmem %s32_s25, 16384  ;;  %p1791_p4 = scmp.lt.s32.totalorder %s32_s25, %s32_s25 }
   0xa   :  { %p1787_p3 = scmp.ne.s32.totalorder %s32_s25, %s1786_s10  ;;  %p1792_p5 = scmp.lt.s32.totalorder %s1786_s10, %s1786_s10 }
   0xc   :  { %p1793_p6 = por %p1792_p5, %p1791_p4 }
   0xe   :  { %p1794_p7 = pnand %p1793_p6, %p1787_p3 }
  0x10   :  { %1797 = shalt.err (!%p1794_p7)
}
  0x11   :  { %s1871_s11 = smov 128   ;;  %s1872_s12 = smov 8  }
  0x12   :  { %37 = dma.hbm_to_vmem [thread:$0]  %s2001_s1, 16384, %s32_s25, [#allocation7], %s1871_s11, %s1871_s11, %s1872_s12  }
  0x13   :  { %s1873_s15 = smov [#allocation3]   ;;  %s1874_s17 = smov [#allocation8]  }
  0x14   :  { %s22_s16 = sshll.u32 %s1873_s15, 4  ;;  %s45_s18 = sshll.u32 %s1874_s17, 4  ;;  %s23_s16 = int_to_ptr.vmem [resolvable:$true] %s22_s16  ;;  %s46_s18 = int_to_ptr.vmem [resolvable:$true] %s45_s18 }
  0x15   :  { %s1798_s21 = scalar_lea.hbm %s2000_s0, 512 }
  0x16   :  { %p1799_p8 = scmp.ne.s32.totalorder %s2000_s0, %s1798_s21  ;;  %p1802_p9 = scmp.lt.u32.totalorder %s1798_s21, %s2000_s0 }
  0x18   :  { %p1804_p10 = pnand %p1802_p9, %p1799_p8 }
  0x1a   :  { %1807 = shalt.err (!%p1804_p10)
}
  0x1b   :  { %s1808_s1 = scalar_lea.vmem %s23_s16, 512  ;;  %p1813_p12 = scmp.lt.s32.totalorder %s23_s16, %s23_s16 }
  0x1c   :  { %p1809_p11 = scmp.ne.s32.totalorder %s23_s16, %s1808_s1  ;;  %p1814_p13 = scmp.lt.s32.totalorder %s1808_s1, %s1808_s1 }
  0x1e   :  { %p1815_p0 = por %p1814_p13, %p1813_p12 }
  0x20   :  { %p1816_p1 = pnand %p1815_p0, %p1809_p11 }
  0x22   :  { %1819 = shalt.err (!%p1816_p1)
}
  0x23   :  { %25 = dma.hbm_to_vmem [thread:$0]  %s2000_s0, 512, %s23_s16, [#allocation4]  }
  0x24   :  { %s1820_s30 = scalar_lea.hbm %s2003_s3, 4096 }
  0x25   :  { %p1821_p2 = scmp.ne.s32.totalorder %s2003_s3, %s1820_s30  ;;  %p1824_p3 = scmp.lt.u32.totalorder %s1820_s30, %s2003_s3 }
  0x27   :  { %p1826_p4 = pnand %p1824_p3, %p1821_p2 }
  0x29   :  { %1829 = shalt.err (!%p1826_p4)
}
  0x2a   :  { %s1830_s14 = scalar_lea.vmem %s46_s18, 4096  ;;  %p1835_p6 = scmp.lt.s32.totalorder %s46_s18, %s46_s18 }
  0x2b   :  { %p1831_p5 = scmp.ne.s32.totalorder %s46_s18, %s1830_s14  ;;  %p1836_p7 = scmp.lt.s32.totalorder %s1830_s14, %s1830_s14 }
  0x2d   :  { %p1837_p8 = por %p1836_p7, %p1835_p6 }
  0x2f   :  { %p1838_p9 = pnand %p1837_p8, %p1831_p5 }
  0x31   :  { %1841 = shalt.err (!%p1838_p9)
}
  0x32   :  { %51 = dma.hbm_to_vmem [thread:$0]  %s2003_s3, 4096, %s46_s18, [#allocation7], %s1871_s11, %s1871_s11, %s1872_s12  }
  0x33   :  { %1864 = dma.done.wait [#allocation4], 512  }
  0x34   :  { %1865 = vsyncadd [#allocation4], 4294966784 }
  0x35   :  { %1866 = dma.done.wait [#allocation7], 20480  }
  0x36   :  { %1867 = vsyncadd [#allocation7], 4294946816  ;;  %v1524_v0 = vld [vmem:[#allocation6 + $0x104] ss:$8 sps:$4 sm:$0xff]   ;;  %v1526_v1 = vld [vmem:[#allocation6 + $0x100] ss:$8 sps:$4 sm:$0xff]  }
  0x37   :  { %920 = vmatprep.subr.bf16.mxu0 %v1524_v0  ;;  %v1527_v2 = vld [vmem:[#allocation6 + $0x114] ss:$8 sps:$4 sm:$0xff]   ;;  %v1529_v3 = vld [vmem:[#allocation6 + $0x110] ss:$8 sps:$4 sm:$0xff]   ;;  %v1530_v4 = vld [vmem:[#allocation6 + $0x124] ss:$8 sps:$4 sm:$0xff]  }
  0x38   :  { %921 = vmatpush1.bf16.msra.mxu0 %v1526_v1  ;;  %v1532_v5 = vld [vmem:[#allocation6 + $0x120] ss:$8 sps:$4 sm:$0xff]   ;;  %v1533_v6 = vld [vmem:[#allocation6 + $0x134] ss:$8 sps:$4 sm:$0xff]   ;;  %v1535_v7 = vld [vmem:[#allocation6 + $0x130] ss:$8 sps:$4 sm:$0xff]  }
  0x39   :  { %922 = vmatprep.subr.bf16.mxu0 %v1527_v2  ;;  %v1536_v8 = vld [vmem:[#allocation6 + $0x144] ss:$8 sps:$4 sm:$0xff]   ;;  %v1538_v9 = vld [vmem:[#allocation6 + $0x140] ss:$8 sps:$4 sm:$0xff]   ;;  %v1539_v10 = vld [vmem:[#allocation6 + $0x154] ss:$8 sps:$4 sm:$0xff]  }
  0x3a   :  { %v1541_v11 = vld [vmem:[#allocation6 + $0x150] ss:$8 sps:$4 sm:$0xff]   ;;  %v1542_v12 = vld [vmem:[#allocation6 + $0x164] ss:$8 sps:$4 sm:$0xff]   ;;  %v1544_v15 = vld [vmem:[#allocation6 + $0x160] ss:$8 sps:$4 sm:$0xff]  }
  0x3b   :  { %v1958_v13 = vld [vmem:[#allocation3 + $0x8] sm:$0xff]  ;;  %v1545_v16 = vld [vmem:[#allocation6 + $0x174] ss:$8 sps:$4 sm:$0xff]   ;;  %v1547_v17 = vld [vmem:[#allocation6 + $0x170] ss:$8 sps:$4 sm:$0xff]  }
  0x3c   :  { %923 = vmatpush1.bf16.msra.mxu0 %v1529_v3  ;;  %v1340_v14 = vcombine.high %v1958_v13, %v1958_v13  ;;  %v1548_v18 = vld [vmem:[#allocation6 + $0x184] ss:$8 sps:$4 sm:$0xff]   ;;  %v1550_v19 = vld [vmem:[#allocation6 + $0x180] ss:$8 sps:$4 sm:$0xff]   ;;  %v1551_v20 = vld [vmem:[#allocation6 + $0x194] ss:$8 sps:$4 sm:$0xff]   ;;  %v1339_v48 = vcombine.low %v1958_v13, %v1958_v13 }
  0x3d   :  { %924 = vmatprep.subr.bf16.mxu0 %v1530_v4  ;;  %v1553_v21 = vld [vmem:[#allocation6 + $0x190] ss:$8 sps:$4 sm:$0xff]   ;;  %v1554_v22 = vld [vmem:[#allocation6 + $0x1a4] ss:$8 sps:$4 sm:$0xff]   ;;  %v1556_v23 = vld [vmem:[#allocation6 + $0x1a0] ss:$8 sps:$4 sm:$0xff]  }
  0x3e   :  { %952 = vmatprep.mubr.bf16.mxu0 %v1340_v14  ;;  %v1557_v24 = vld [vmem:[#allocation6 + $0x1b4] ss:$8 sps:$4 sm:$0xff]   ;;  %v1619_v25 = vld [vmem:[#allocation6 + $0x4] ss:$8 sps:$4 sm:$0xff]   ;;  %v1621_v26 = vld [vmem:[#allocation6] ss:$8 sps:$4 sm:$0xff]  }
  0x3f   :  { %v1559_v27 = vld [vmem:[#allocation6 + $0x1b0] ss:$8 sps:$4 sm:$0xff]   ;;  %v1560_v28 = vld [vmem:[#allocation6 + $0x1c4] ss:$8 sps:$4 sm:$0xff]   ;;  %879 = vmatprep.subr.bf16.mxu1 %v1619_v25  ;;  %v1625_v29 = vld [vmem:[#allocation6 + $0x14] ss:$8 sps:$4 sm:$0xff]  }
  0x40   :  { %925 = vmatpush1.bf16.msra.mxu0 %v1532_v5  ;;  %880 = vmatpush1.bf16.msra.mxu1 %v1621_v26  ;;  %v1627_v30 = vld [vmem:[#allocation6 + $0x10] ss:$8 sps:$4 sm:$0xff]   ;;  %v1562_v31 = vld [vmem:[#allocation6 + $0x1c0] ss:$8 sps:$4 sm:$0xff]   ;;  %v1563_v32 = vld [vmem:[#allocation6 + $0x1d4] ss:$8 sps:$4 sm:$0xff]  }
  0x41   :  { %926 = vmatprep.subr.bf16.mxu0 %v1533_v6  ;;  %881 = vmatprep.subr.bf16.mxu1 %v1625_v29  ;;  %v1633_v33 = vld [vmem:[#allocation6 + $0x24] ss:$8 sps:$4 sm:$0xff]   ;;  %v1635_v34 = vld [vmem:[#allocation6 + $0x20] ss:$8 sps:$4 sm:$0xff]   ;;  %v1639_v35 = vld [vmem:[#allocation6 + $0x34] ss:$8 sps:$4 sm:$0xff]  }
  0x42   :  { %v1565_v36 = vld [vmem:[#allocation6 + $0x1d0] ss:$8 sps:$4 sm:$0xff]   ;;  %v1566_v37 = vld [vmem:[#allocation6 + $0x1e4] ss:$8 sps:$4 sm:$0xff]   ;;  %v1568_v40 = vld [vmem:[#allocation6 + $0x1e0] ss:$8 sps:$4 sm:$0xff]  }
  0x43   :  { %v1641_v38 = vld [vmem:[#allocation6 + $0x30] ss:$8 sps:$4 sm:$0xff]   ;;  %v1645_v39 = vld [vmem:[#allocation6 + $0x44] ss:$8 sps:$4 sm:$0xff]   ;;  %v1569_v41 = vld [vmem:[#allocation6 + $0x1f4] ss:$8 sps:$4 sm:$0xff]  }
  0x44   :  { %927 = vmatpush1.bf16.msra.mxu0 %v1535_v7  ;;  %882 = vmatpush1.bf16.msra.mxu1 %v1627_v30  ;;  %v1647_v42 = vld [vmem:[#allocation6 + $0x40] ss:$8 sps:$4 sm:$0xff]   ;;  %v1651_v43 = vld [vmem:[#allocation6 + $0x54] ss:$8 sps:$4 sm:$0xff]   ;;  %v1571_v44 = vld [vmem:[#allocation6 + $0x1f0] ss:$8 sps:$4 sm:$0xff]  }
  0x45   :  { %928 = vmatprep.subr.bf16.mxu0 %v1536_v8  ;;  %883 = vmatprep.subr.bf16.mxu1 %v1633_v33  ;;  %v1576_v45 = vld [vmem:[#allocation6 + $0x204] ss:$8 sps:$4 sm:$0xff]   ;;  %v1962_v46 = vld [vmem:[#allocation3 + $0x10] sm:$0xff]  ;;  %v1574_v50 = vld [vmem:[#allocation6 + $0x200] ss:$8 sps:$4 sm:$0xff]  }
  0x46   :  { %v1653_v47 = vld [vmem:[#allocation6 + $0x50] ss:$8 sps:$4 sm:$0xff]   ;;  %v1657_v49 = vld [vmem:[#allocation6 + $0x64] ss:$8 sps:$4 sm:$0xff]   ;;  %v1342_v51 = vcombine.high %v1962_v46, %v1962_v46  ;;  %v1579_v52 = vld [vmem:[#allocation6 + $0x214] ss:$8 sps:$4 sm:$0xff]  }
  0x47   :  { %v1659_v53 = vld [vmem:[#allocation6 + $0x60] ss:$8 sps:$4 sm:$0xff]   ;;  %v1663_v54 = vld [vmem:[#allocation6 + $0x74] ss:$8 sps:$4 sm:$0xff]   ;;  %v1577_v55 = vld [vmem:[#allocation6 + $0x210] ss:$8 sps:$4 sm:$0xff]  }
  0x48   :  { %929 = vmatpush1.bf16.msra.mxu0 %v1538_v9  ;;  %884 = vmatpush1.bf16.msra.mxu1 %v1635_v34  ;;  %v1582_v56 = vld [vmem:[#allocation6 + $0x224] ss:$8 sps:$4 sm:$0xff]   ;;  %v1665_v57 = vld [vmem:[#allocation6 + $0x70] ss:$8 sps:$4 sm:$0xff]   ;;  %v1580_v59 = vld [vmem:[#allocation6 + $0x220] ss:$8 sps:$4 sm:$0xff]  }
  0x49   :  { %930 = vmatprep.subr.bf16.mxu0 %v1539_v10  ;;  %885 = vmatprep.subr.bf16.mxu1 %v1639_v35  ;;  %v1669_v58 = vld [vmem:[#allocation6 + $0x84] ss:$8 sps:$4 sm:$0xff]   ;;  %v1585_v60 = vld [vmem:[#allocation6 + $0x234] ss:$8 sps:$4 sm:$0xff]   ;;  %v1671_v61 = vld [vmem:[#allocation6 + $0x80] ss:$8 sps:$4 sm:$0xff]  }
  0x4a   :  { %v1675_v62 = vld [vmem:[#allocation6 + $0x94] ss:$8 sps:$4 sm:$0xff]   ;;  %v1583_v63 = vld [vmem:[#allocation6 + $0x230] ss:$8 sps:$4 sm:$0xff]   ;;  %v1588_v0 = vld [vmem:[#allocation6 + $0x244] ss:$8 sps:$4 sm:$0xff]  }
  0x4b   :  { %v1677_v1 = vld [vmem:[#allocation6 + $0x90] ss:$8 sps:$4 sm:$0xff]   ;;  %v1681_v2 = vld [vmem:[#allocation6 + $0xa4] ss:$8 sps:$4 sm:$0xff]   ;;  %v1586_v3 = vld [vmem:[#allocation6 + $0x240] ss:$8 sps:$4 sm:$0xff]  }
  0x4c   :  { %931 = vmatpush1.bf16.msra.mxu0 %v1541_v11  ;;  %886 = vmatpush1.bf16.msra.mxu1 %v1641_v38  ;;  %v1591_v4 = vld [vmem:[#allocation6 + $0x254] ss:$8 sps:$4 sm:$0xff]   ;;  %v1683_v5 = vld [vmem:[#allocation6 + $0xa0] ss:$8 sps:$4 sm:$0xff]   ;;  %v1589_v7 = vld [vmem:[#allocation6 + $0x250] ss:$8 sps:$4 sm:$0xff]  }
  0x4d   :  { %932 = vmatprep.subr.bf16.mxu0 %v1542_v12  ;;  %887 = vmatprep.subr.bf16.mxu1 %v1645_v39  ;;  %v1687_v6 = vld [vmem:[#allocation6 + $0xb4] ss:$8 sps:$4 sm:$0xff]   ;;  %v1594_v8 = vld [vmem:[#allocation6 + $0x264] ss:$8 sps:$4 sm:$0xff]   ;;  %v1689_v10 = vld [vmem:[#allocation6 + $0xb0] ss:$8 sps:$4 sm:$0xff]  }
  0x4e   :  { %v67_v9 = vld [vmem:[#allocation3] sm:$0xff]  ;;  %v1597_v14 = vld [vmem:[#allocation6 + $0x274] ss:$8 sps:$4 sm:$0xff]   ;;  %v1601_v25 = vld [vmem:[#allocation6 + $0x290] ss:$8 sps:$4 sm:$0xff]  }
  0x4f   :  { %v1338_v11 = vcombine.high %v67_v9, %v67_v9  ;;  %v1693_v12 = vld [vmem:[#allocation6 + $0xc4] ss:$8 sps:$4 sm:$0xff]   ;;  %v1592_v13 = vld [vmem:[#allocation6 + $0x260] ss:$8 sps:$4 sm:$0xff]   ;;  %v1609_v30 = vld [vmem:[#allocation6 + $0x2b4] ss:$8 sps:$4 sm:$0xff]  }
  0x50   :  { %933 = vmatpush1.bf16.msra.mxu0 %v1544_v15  ;;  %888 = vmatpush1.bf16.msra.mxu1 %v1647_v42  ;;  %v1695_v15 = vld [vmem:[#allocation6 + $0xc0] ss:$8 sps:$4 sm:$0xff]   ;;  %v1606_v26 = vld [vmem:[#allocation6 + $0x2a4] ss:$8 sps:$4 sm:$0xff]   ;;  %v1729_v33 = vld [vmem:[#allocation8 + $0x14] ss:$8 sps:$4 sm:$0xff]  }
  0x51   :  { %934 = vmatprep.subr.bf16.mxu0 %v1545_v16  ;;  %889 = vmatprep.subr.bf16.mxu1 %v1651_v43  ;;  %v1699_v16 = vld [vmem:[#allocation6 + $0xd4] ss:$8 sps:$4 sm:$0xff]   ;;  %v1604_v29 = vld [vmem:[#allocation6 + $0x2a0] ss:$8 sps:$4 sm:$0xff]   ;;  %v1607_v34 = vld [vmem:[#allocation6 + $0x2b0] ss:$8 sps:$4 sm:$0xff]  }
  0x52   :  { %911 = vmatprep.mubr.bf16.mxu1 %v1338_v11  ;;  %v1612_v35 = vld [vmem:[#allocation6 + $0x2c4] ss:$8 sps:$4 sm:$0xff]   ;;  %v1610_v38 = vld [vmem:[#allocation6 + $0x2c0] ss:$8 sps:$4 sm:$0xff]   ;;  %v1615_v39 = vld [vmem:[#allocation6 + $0x2d4] ss:$8 sps:$4 sm:$0xff]  }
  0x53   :  { %v1613_v42 = vld [vmem:[#allocation6 + $0x2d0] ss:$8 sps:$4 sm:$0xff]   ;;  %v1618_v43 = vld [vmem:[#allocation6 + $0x2e4] ss:$8 sps:$4 sm:$0xff]   ;;  %v1754_v11 = vld [vmem:[#allocation8 + $0xa0] ss:$8 sps:$4 sm:$0xff]  }
  0x54   :  { %935 = vmatpush1.bf16.msra.mxu0 %v1547_v17  ;;  %890 = vmatpush1.bf16.msra.mxu1 %v1653_v47  ;;  %v1595_v17 = vld [vmem:[#allocation6 + $0x270] ss:$8 sps:$4 sm:$0xff]   ;;  %v1616_v47 = vld [vmem:[#allocation6 + $0x2e0] ss:$8 sps:$4 sm:$0xff]  }
  0x55   :  { %936 = vmatprep.subr.bf16.mxu0 %v1548_v18  ;;  %891 = vmatprep.subr.bf16.mxu1 %v1657_v49  ;;  %v1600_v18 = vld [vmem:[#allocation6 + $0x284] ss:$8 sps:$4 sm:$0xff]   ;;  %v1736_v49 = vld [vmem:[#allocation8 + $0x40] ss:$8 sps:$4 sm:$0xff]  }
  0x58   :  { %937 = vmatpush1.bf16.msra.mxu0 %v1550_v19  ;;  %892 = vmatpush1.bf16.msra.mxu1 %v1659_v53  ;;  %v1701_v19 = vld [vmem:[#allocation6 + $0xd0] ss:$8 sps:$4 sm:$0xff]  }
  0x59   :  { %938 = vmatprep.subr.bf16.mxu0 %v1551_v20  ;;  %893 = vmatprep.subr.bf16.mxu1 %v1663_v54  ;;  %v1705_v20 = vld [vmem:[#allocation6 + $0xe4] ss:$8 sps:$4 sm:$0xff]   ;;  %v1968_v53 = vld [vmem:[#allocation3 + $0x18] sm:$0xff] }
  0x5a   :  { %v1739_v54 = vld [vmem:[#allocation8 + $0x50] ss:$8 sps:$4 sm:$0xff]  }
  0x5c   :  { %939 = vmatpush1.bf16.msra.mxu0 %v1553_v21  ;;  %894 = vmatpush1.bf16.msra.mxu1 %v1665_v57  ;;  %v1598_v21 = vld [vmem:[#allocation6 + $0x280] ss:$8 sps:$4 sm:$0xff]  }
  0x5d   :  { %940 = vmatprep.subr.bf16.mxu0 %v1554_v22  ;;  %895 = vmatprep.subr.bf16.mxu1 %v1669_v58  ;;  %v1603_v22 = vld [vmem:[#allocation6 + $0x294] ss:$8 sps:$4 sm:$0xff]   ;;  %v1630_v57 = vld [vmem:[#allocation6 + $0x300] ss:$8 sps:$4 sm:$0xff]   ;;  %v1344_v58 = vcombine.high %v1968_v53, %v1968_v53 }
  0x60   :  { %941 = vmatpush1.bf16.msra.mxu0 %v1556_v23  ;;  %896 = vmatpush1.bf16.msra.mxu1 %v1671_v61  ;;  %v1707_v23 = vld [vmem:[#allocation6 + $0xe0] ss:$8 sps:$4 sm:$0xff]   ;;  %v1747_v61 = vld [vmem:[#allocation8 + $0x74] ss:$8 sps:$4 sm:$0xff]  }
  0x61   :  { %942 = vmatprep.subr.bf16.mxu0 %v1557_v24  ;;  %897 = vmatprep.subr.bf16.mxu1 %v1675_v62  ;;  %v1711_v24 = vld [vmem:[#allocation6 + $0xf4] ss:$8 sps:$4 sm:$0xff]   ;;  %v1636_v62 = vld [vmem:[#allocation6 + $0x310] ss:$8 sps:$4 sm:$0xff]  }
  0x64   :  { %943 = vmatpush1.bf16.msra.mxu0 %v1559_v27  ;;  %898 = vmatpush1.bf16.msra.mxu1 %v1677_v1  ;;  %v1713_v27 = vld [vmem:[#allocation6 + $0xf0] ss:$8 sps:$4 sm:$0xff]   ;;  %v1642_v1 = vld [vmem:[#allocation6 + $0x320] ss:$8 sps:$4 sm:$0xff]  }
  0x65   :  { %944 = vmatprep.subr.bf16.mxu0 %v1560_v28  ;;  %899 = vmatprep.subr.bf16.mxu1 %v1681_v2  ;;  %v1726_v28 = vld [vmem:[#allocation8 + $0x4] ss:$8 sps:$4 sm:$0xff]   ;;  %v1650_v2 = vld [vmem:[#allocation6 + $0x334] ss:$8 sps:$4 sm:$0xff]  }
  0x68   :  { %945 = vmatpush1.bf16.msra.mxu0 %v1562_v31  ;;  %900 = vmatpush1.bf16.msra.mxu1 %v1683_v5  ;;  %v1337_v31 = vcombine.low %v67_v9, %v67_v9  ;;  %v1648_v5 = vld [vmem:[#allocation6 + $0x330] ss:$8 sps:$4 sm:$0xff]   ;;  %v1654_v9 = vld [vmem:[#allocation6 + $0x340] ss:$8 sps:$4 sm:$0xff]  }
  0x69   :  { %946 = vmatprep.subr.bf16.mxu0 %v1563_v32  ;;  %901 = vmatprep.subr.bf16.mxu1 %v1687_v6  ;;  %v1724_v32 = vld [vmem:[#allocation8] ss:$8 sps:$4 sm:$0xff]   ;;  %v1656_v6 = vld [vmem:[#allocation6 + $0x344] ss:$8 sps:$4 sm:$0xff]  }
  0x6c   :  { %947 = vmatpush1.bf16.msra.mxu0 %v1565_v36  ;;  %902 = vmatpush1.bf16.msra.mxu1 %v1689_v10  ;;  %v1727_v36 = vld [vmem:[#allocation8 + $0x10] ss:$8 sps:$4 sm:$0xff]   ;;  %v1662_v10 = vld [vmem:[#allocation6 + $0x354] ss:$8 sps:$4 sm:$0xff]  }
  0x6d   :  { %948 = vmatprep.subr.bf16.mxu0 %v1566_v37  ;;  %903 = vmatprep.subr.bf16.mxu1 %v1693_v12  ;;  %v1732_v37 = vld [vmem:[#allocation8 + $0x24] ss:$8 sps:$4 sm:$0xff]   ;;  %v1759_v12 = vld [vmem:[#allocation8 + $0xb4] ss:$8 sps:$4 sm:$0xff]  }
  0x70   :  { %949 = vmatpush1.bf16.msra.mxu0 %v1568_v40  ;;  %904 = vmatpush1.bf16.msra.mxu1 %v1695_v15  ;;  %v1730_v40 = vld [vmem:[#allocation8 + $0x20] ss:$8 sps:$4 sm:$0xff]   ;;  %v1757_v15 = vld [vmem:[#allocation8 + $0xb0] ss:$8 sps:$4 sm:$0xff]  }
  0x71   :  { %950 = vmatprep.subr.bf16.mxu0 %v1569_v41  ;;  %905 = vmatprep.subr.bf16.mxu1 %v1699_v16  ;;  %v1735_v41 = vld [vmem:[#allocation8 + $0x34] ss:$8 sps:$4 sm:$0xff]   ;;  %v1762_v16 = vld [vmem:[#allocation8 + $0xc4] ss:$8 sps:$4 sm:$0xff]  }
  0x74   :  { %951 = vmatpush1.bf16.msra.mxu0 %v1571_v44  ;;  %906 = vmatpush1.bf16.msra.mxu1 %v1701_v19  ;;  %v1733_v44 = vld [vmem:[#allocation8 + $0x30] ss:$8 sps:$4 sm:$0xff]   ;;  %v1760_v19 = vld [vmem:[#allocation8 + $0xc0] ss:$8 sps:$4 sm:$0xff]  }
  0x75   :  { %961 = vmatprep.subr.bf16.mxu0 %v1576_v45  ;;  %907 = vmatprep.subr.bf16.mxu1 %v1705_v20  ;;  %v1738_v45 = vld [vmem:[#allocation8 + $0x44] ss:$8 sps:$4 sm:$0xff]   ;;  %v1672_v20 = vld [vmem:[#allocation6 + $0x370] ss:$8 sps:$4 sm:$0xff]  }
  0x77   :  { %953 = vmatmul.mubr.bf16.vlgmr.msra.gmra.mrb[0].mxu0 %v1339_v48  ;;  %v1624_v48 = vld [vmem:[#allocation6 + $0x2f4] ss:$8 sps:$4 sm:$0xff]  }
  0x78   :  { %962 = vmatpush1.bf16.msra.mxu0 %v1574_v50  ;;  %993 = vmatprep.mubr.bf16.mxu0 %v1342_v51  ;;  %v1741_v50 = vld [vmem:[#allocation8 + $0x54] ss:$8 sps:$4 sm:$0xff]   ;;  %v1622_v51 = vld [vmem:[#allocation6 + $0x2f0] ss:$8 sps:$4 sm:$0xff]  }
  0x79   :  { %963 = vmatprep.subr.bf16.mxu0 %v1579_v52  ;;  %908 = vmatpush1.bf16.msra.mxu1 %v1707_v23  ;;  %v1632_v52 = vld [vmem:[#allocation6 + $0x304] ss:$8 sps:$4 sm:$0xff]   ;;  %v1686_v23 = vld [vmem:[#allocation6 + $0x394] ss:$8 sps:$4 sm:$0xff]  }
  0x7a   :  { %909 = vmatprep.subr.bf16.mxu1 %v1711_v24  ;;  %v1684_v24 = vld [vmem:[#allocation6 + $0x390] ss:$8 sps:$4 sm:$0xff]  }
  0x7c   :  { %964 = vmatpush1.bf16.msra.mxu0 %v1577_v55  ;;  %v1341_v55 = vcombine.low %v1962_v46, %v1962_v46  ;;  %v1745_v46 = vld [vmem:[#allocation8 + $0x70] ss:$8 sps:$4 sm:$0xff]  }
  0x7d   :  { %965 = vmatprep.subr.bf16.mxu0 %v1582_v56  ;;  %910 = vmatpush1.bf16.msra.mxu1 %v1713_v27  ;;  %v1744_v56 = vld [vmem:[#allocation8 + $0x64] ss:$8 sps:$4 sm:$0xff]   ;;  %v1698_v27 = vld [vmem:[#allocation6 + $0x3b4] ss:$8 sps:$4 sm:$0xff]  }
  0x7e   :  { %1251 = vmatprep.subr.bf16.mxu1 %v1726_v28  ;;  %v1696_v28 = vld [vmem:[#allocation6 + $0x3b0] ss:$8 sps:$4 sm:$0xff]  }
  0x80   :  { %966 = vmatpush1.bf16.msra.mxu0 %v1580_v59  ;;  %912 = vmatmul.mubr.bf16.vlgmr.msra.gmra.mrb[0].mxu1 %v1337_v31  ;;  %v1638_v59 = vld [vmem:[#allocation6 + $0x314] ss:$8 sps:$4 sm:$0xff]  }
  0x81   :  { %967 = vmatprep.subr.bf16.mxu0 %v1585_v60  ;;  %1252 = vmatpush1.bf16.msra.mxu1 %v1724_v32  ;;  %v1742_v60 = vld [vmem:[#allocation8 + $0x60] ss:$8 sps:$4 sm:$0xff]   ;;  %v1710_v31 = vld [vmem:[#allocation6 + $0x3d4] ss:$8 sps:$4 sm:$0xff]   ;;  %v1708_v32 = vld [vmem:[#allocation6 + $0x3d0] ss:$8 sps:$4 sm:$0xff]  }
  0x82   :  { %1253 = vmatprep.subr.bf16.mxu1 %v1729_v33  ;;  %v1716_v33 = vld [vmem:[#allocation6 + $0x3e4] ss:$8 sps:$4 sm:$0xff]  }
  0x84   :  { %968 = vmatpush1.bf16.msra.mxu0 %v1583_v63  ;;  %v1644_v63 = vld [vmem:[#allocation6 + $0x324] ss:$8 sps:$4 sm:$0xff]  }
  0x85   :  { %969 = vmatprep.subr.bf16.mxu0 %v1588_v0  ;;  %1254 = vmatpush1.bf16.msra.mxu1 %v1727_v36  ;;  %v1750_v0 = vld [vmem:[#allocation8 + $0x84] ss:$8 sps:$4 sm:$0xff]   ;;  %v1719_v36 = vld [vmem:[#allocation6 + $0x3f0] ss:$8 sps:$4 sm:$0xff]  }
  0x86   :  { %1255 = vmatprep.subr.bf16.mxu1 %v1732_v37  ;;  %v1343_v37 = vcombine.low %v1968_v53, %v1968_v53 }
  0x88   :  { %970 = vmatpush1.bf16.msra.mxu0 %v1586_v3  ;;  %v1748_v3 = vld [vmem:[#allocation8 + $0x80] ss:$8 sps:$4 sm:$0xff]  }
  0x89   :  { %971 = vmatprep.subr.bf16.mxu0 %v1591_v4  ;;  %1256 = vmatpush1.bf16.msra.mxu1 %v1730_v40  ;;  %v1753_v4 = vld [vmem:[#allocation8 + $0x94] ss:$8 sps:$4 sm:$0xff]   ;;  %v1768_v40 = vld [vmem:[#allocation8 + $0xe4] ss:$8 sps:$4 sm:$0xff]  }
  0x8a   :  { %1257 = vmatprep.subr.bf16.mxu1 %v1735_v41  ;;  %v1766_v41 = vld [vmem:[#allocation8 + $0xe0] ss:$8 sps:$4 sm:$0xff]  }
  0x8c   :  { %972 = vmatpush1.bf16.msra.mxu0 %v1589_v7  ;;  %v1751_v7 = vld [vmem:[#allocation8 + $0x90] ss:$8 sps:$4 sm:$0xff]  }
  0x8d   :  { %973 = vmatprep.subr.bf16.mxu0 %v1594_v8  ;;  %1258 = vmatpush1.bf16.msra.mxu1 %v1733_v44  ;;  %v1756_v8 = vld [vmem:[#allocation8 + $0xa4] ss:$8 sps:$4 sm:$0xff]  }
  0x8e   :  { %1259 = vmatprep.subr.bf16.mxu1 %v1738_v45 }
  0x90   :  { %974 = vmatpush1.bf16.msra.mxu0 %v1592_v13  ;;  %v1660_v13 = vld [vmem:[#allocation6 + $0x350] ss:$8 sps:$4 sm:$0xff]  }
  0x91   :  { %975 = vmatprep.subr.bf16.mxu0 %v1597_v14  ;;  %1260 = vmatpush1.bf16.msra.mxu1 %v1736_v49  ;;  %v1668_v14 = vld [vmem:[#allocation6 + $0x364] ss:$8 sps:$4 sm:$0xff]   ;;  %v201_v49 = vlaneseq }
  0x92   :  { %1261 = vmatprep.subr.bf16.mxu1 %v1741_v50 }
  0x93   :  { %v202_v50 = vshrl.u32 %v201_v49, 7 }
  0x94   :  { %976 = vmatpush1.bf16.msra.mxu0 %v1595_v17  ;;  %v1666_v17 = vld [vmem:[#allocation6 + $0x360] ss:$8 sps:$4 sm:$0xff]  }
  0x95   :  { %977 = vmatprep.subr.bf16.mxu0 %v1600_v18  ;;  %1262 = vmatpush1.bf16.msra.mxu1 %v1739_v54  ;;  %v1674_v18 = vld [vmem:[#allocation6 + $0x374] ss:$8 sps:$4 sm:$0xff]   ;;  %v207_v53 = vsub.s32 1, %v202_v50 }
  0x96   :  { %1263 = vmatprep.subr.bf16.mxu1 %v1744_v56 }
  0x98   :  { %978 = vmatpush1.bf16.msra.mxu0 %v1598_v21  ;;  %v1680_v21 = vld [vmem:[#allocation6 + $0x384] ss:$8 sps:$4 sm:$0xff]  }
  0x99   :  { %979 = vmatprep.subr.bf16.mxu0 %v1603_v22  ;;  %1264 = vmatpush1.bf16.msra.mxu1 %v1742_v60  ;;  %v1678_v22 = vld [vmem:[#allocation6 + $0x380] ss:$8 sps:$4 sm:$0xff]  }
  0x9a   :  { %1265 = vmatprep.subr.bf16.mxu1 %v1747_v61 }
  0x9c   :  { %980 = vmatpush1.bf16.msra.mxu0 %v1601_v25  ;;  %v1692_v25 = vld [vmem:[#allocation6 + $0x3a4] ss:$8 sps:$4 sm:$0xff]  }
  0x9d   :  { %981 = vmatprep.subr.bf16.mxu0 %v1606_v26  ;;  %1266 = vmatpush1.bf16.msra.mxu1 %v1745_v46  ;;  %v1690_v26 = vld [vmem:[#allocation6 + $0x3a0] ss:$8 sps:$4 sm:$0xff]  }
  0x9e   :  { %1267 = vmatprep.subr.bf16.mxu1 %v1750_v0 }
  0xa0   :  { %982 = vmatpush1.bf16.msra.mxu0 %v1604_v29  ;;  %v1704_v29 = vld [vmem:[#allocation6 + $0x3c4] ss:$8 sps:$4 sm:$0xff]  }
  0xa1   :  { %983 = vmatprep.subr.bf16.mxu0 %v1609_v30  ;;  %1268 = vmatpush1.bf16.msra.mxu1 %v1748_v3  ;;  %v1702_v30 = vld [vmem:[#allocation6 + $0x3c0] ss:$8 sps:$4 sm:$0xff]  }
  0xa2   :  { %1269 = vmatprep.subr.bf16.mxu1 %v1753_v4  ;;  %v1079_v3 = vld [vmem:[%s2004_s4] sm:$0x3] }
  0xa4   :  { %984 = vmatpush1.bf16.msra.mxu0 %v1607_v34  ;;  %v1714_v34 = vld [vmem:[#allocation6 + $0x3e0] ss:$8 sps:$4 sm:$0xff]  }
  0xa5   :  { %985 = vmatprep.subr.bf16.mxu0 %v1612_v35  ;;  %1270 = vmatpush1.bf16.msra.mxu1 %v1751_v7  ;;  %v1721_v35 = vld [vmem:[#allocation6 + $0x3f4] ss:$8 sps:$4 sm:$0xff]  }
  0xa6   :  { %1271 = vmatprep.subr.bf16.mxu1 %v1756_v8 }
  0xa8   :  { %986 = vmatpush1.bf16.msra.mxu0 %v1610_v38  ;;  %v1763_v38 = vld [vmem:[#allocation8 + $0xd0] ss:$8 sps:$4 sm:$0xff]  }
  0xa9   :  { %987 = vmatprep.subr.bf16.mxu0 %v1615_v39  ;;  %1272 = vmatpush1.bf16.msra.mxu1 %v1754_v11  ;;  %v1765_v39 = vld [vmem:[#allocation8 + $0xd4] ss:$8 sps:$4 sm:$0xff]  }
  0xaa   :  { %1273 = vmatprep.subr.bf16.mxu1 %v1759_v12 }
  0xac   :  { %988 = vmatpush1.bf16.msra.mxu0 %v1613_v42  ;;  %v1771_v42 = vld [vmem:[#allocation8 + $0xf4] ss:$8 sps:$4 sm:$0xff]  }
  0xad   :  { %989 = vmatprep.subr.bf16.mxu0 %v1618_v43  ;;  %1274 = vmatpush1.bf16.msra.mxu1 %v1757_v15  ;;  %v1769_v43 = vld [vmem:[#allocation8 + $0xf0] ss:$8 sps:$4 sm:$0xff]  }
  0xae   :  { %1275 = vmatprep.subr.bf16.mxu1 %v1762_v16 }
  0xb0   :  { %990 = vmatpush1.bf16.msra.mxu0 %v1616_v47 }
  0xb1   :  { %991 = vmatprep.subr.bf16.mxu0 %v1624_v48  ;;  %1276 = vmatpush1.bf16.msra.mxu1 %v1760_v19 }
  0xb2   :  { %1277 = vmatprep.subr.bf16.mxu1 %v1765_v39 }
  0xb4   :  { %992 = vmatpush1.bf16.msra.mxu0 %v1622_v51  ;;  %v203_v51 = vsub.s32 0, %v202_v50 }
  0xb5   :  { %1002 = vmatprep.subr.bf16.mxu0 %v1632_v52  ;;  %1278 = vmatpush1.bf16.msra.mxu1 %v1763_v38  ;;  %v199_v52 = vld [vmem:[%s2002_s2] sm:$0x3] }
  0xb6   :  { %1279 = vmatprep.subr.bf16.mxu1 %v1768_v40  ;;  %v204_v54 = vrot.slane %v199_v52, %v203_v51  ;;  %v1084_v4 = vrot.slane %v1079_v3, %v203_v51 }
  0xb7   :  { %994 = vmatmul.mubr.bf16.vlgmr.msra.gmra.mrb[0].mxu0 %v1341_v55  ;;  %v208_v55 = vrot.slane %v199_v52, %v207_v53 }
  0xb8   :  { %1003 = vmatpush1.bf16.msra.mxu0 %v1630_v57  ;;  %1034 = vmatprep.mubr.bf16.mxu0 %v1344_v58 }
  0xb9   :  { %1004 = vmatprep.subr.bf16.mxu0 %v1638_v59  ;;  %1280 = vmatpush1.bf16.msra.mxu1 %v1766_v41 }
  0xba   :  { %1281 = vmatprep.subr.bf16.mxu1 %v1771_v42 }
  0xbc   :  { %1005 = vmatpush1.bf16.msra.mxu0 %v1636_v62 }
  0xbd   :  { %1006 = vmatprep.subr.bf16.mxu0 %v1644_v63  ;;  %1282 = vmatpush1.bf16.msra.mxu1 %v1769_v43 }
  0xc0   :  { %1007 = vmatpush1.bf16.msra.mxu0 %v1642_v1 }
  0xc1   :  { %1008 = vmatprep.subr.bf16.mxu0 %v1650_v2 }
  0xc4   :  { %1009 = vmatpush1.bf16.msra.mxu0 %v1648_v5  ;;  %v1088_v5 = vrot.slane %v1079_v3, %v207_v53 }
  0xc5   :  { %1010 = vmatprep.subr.bf16.mxu0 %v1656_v6  ;;  %v1294_v6 = vld [vmem:[%s2005_s5] sm:$0x3]  ;;  %s1875_s5 = smov [#allocation9]  }
  0xc6   :  { %s1327_s19 = sshll.u32 %s1875_s5, 4  ;;  %s1328_s19 = int_to_ptr.vmem [resolvable:$true] %s1327_s19 }
  0xc7   :  { %s1842_s20 = scalar_lea.vmem %s1328_s19, 128  ;;  %p1847_p11 = scmp.lt.s32.totalorder %s1328_s19, %s1328_s19 }
  0xc8   :  { %1011 = vmatpush1.bf16.msra.mxu0 %v1654_v9  ;;  %p1843_p10 = scmp.ne.s32.totalorder %s1328_s19, %s1842_s20  ;;  %p1848_p12 = scmp.lt.s32.totalorder %s1842_s20, %s1842_s20 }
  0xc9   :  { %1012 = vmatprep.subr.bf16.mxu0 %v1662_v10  ;;  %v1299_v10 = vrot.slane %v1294_v6, %v203_v51 }
  0xca   :  { %p1849_p13 = por %p1848_p12, %p1847_p11 }
  0xcc   :  { %1013 = vmatpush1.bf16.msra.mxu0 %v1660_v13  ;;  %v1303_v13 = vrot.slane %v1294_v6, %v207_v53  ;;  %p1850_p0 = pnand %p1849_p13, %p1843_p10 }
  0xcd   :  { %1014 = vmatprep.subr.bf16.mxu0 %v1668_v14 }
  0xd0   :  { %1015 = vmatpush1.bf16.msra.mxu0 %v1666_v17 }
  0xd1   :  { %1016 = vmatprep.subr.bf16.mxu0 %v1674_v18 }
  0xd4   :  { %1017 = vmatpush1.bf16.msra.mxu0 %v1672_v20  ;;  %v1312_v20 = vstv %s2006_s6 }
  0xd5   :  { %1018 = vmatprep.subr.bf16.mxu0 %v1680_v21 }
  0xd8   :  { %1019 = vmatpush1.bf16.msra.mxu0 %v1678_v22 }
  0xd9   :  { %1020 = vmatprep.subr.bf16.mxu0 %v1686_v23 }
  0xdc   :  { %1021 = vmatpush1.bf16.msra.mxu0 %v1684_v24 }
  0xdd   :  { %1022 = vmatprep.subr.bf16.mxu0 %v1692_v25 }
  0xe0   :  { %1023 = vmatpush1.bf16.msra.mxu0 %v1690_v26 }
  0xe1   :  { %1024 = vmatprep.subr.bf16.mxu0 %v1698_v27 }
  0xe4   :  { %1025 = vmatpush1.bf16.msra.mxu0 %v1696_v28 }
  0xe5   :  { %1026 = vmatprep.subr.bf16.mxu0 %v1704_v29 }
  0xe8   :  { %1027 = vmatpush1.bf16.msra.mxu0 %v1702_v30 }
  0xe9   :  { %1028 = vmatprep.subr.bf16.mxu0 %v1710_v31 }
  0xec   :  { %1029 = vmatpush1.bf16.msra.mxu0 %v1708_v32 }
  0xed   :  { %1030 = vmatprep.subr.bf16.mxu0 %v1716_v33 }
  0xf0   :  { %1031 = vmatpush1.bf16.msra.mxu0 %v1714_v34 }
  0xf1   :  { %1032 = vmatprep.subr.bf16.mxu0 %v1721_v35 }
  0xf4   :  { %1033 = vmatpush1.bf16.msra.mxu0 %v1719_v36 }
  0xf7   :  { %1035 = vmatmul.mubr.bf16.vlgmr.msra.gmra.mrb[0].mxu0 %v1343_v37 }
 0x153   :  { %v913_v44 = vpop.f32.mrb[0].mxu1 }
 0x154   :  { %v915_v45 = vpop.f32.mrb[1].mxu1  ;;  %v914_v56 = vadd.f32 %v913_v44, %v204_v54 }
 0x155   :  { %v917_v47 = vpop.f32.mrb[2].mxu1  ;;  %v916_v57 = vadd.f32 %v915_v45, %v208_v55 }
 0x156   :  { %v918_v48 = vpop.f32.mrb[3].mxu1 }
 0x1ca   :  { %v1036_v58 = vpop.f32.mrb[0].mxu0 }
 0x1cb   :  { %v1507_v59 = vadd.f32 %v1036_v58, %v914_v56  ;;  %v1038_v60 = vpop.f32.mrb[1].mxu0 }
 0x1cc   :  { %v1509_v61 = vadd.f32 %v1038_v60, %v916_v57  ;;  %v1040_v62 = vpop.f32.mrb[2].mxu0 }
 0x1cd   :  { %v1043_v63 = vmax.f32 %v1507_v59, 0.0  ;;  %v1041_v46 = vpop.f32.mrb[3].mxu0 }
 0x1ce   :  { %v1044_v0 = vmax.f32 %v1509_v61, 0.0 }
 0x1cf   :  { %v1045_v2 = vpack.c.bf16 %v1043_v63, %v1043_v63 }
 0x1d0   :  { %v1046_v1 = vpack.c.bf16 %v1044_v0, %v1044_v0 }
 0x1d2   :  { %1283 = vmatprep.mubr.bf16.mxu1 %v1046_v1 }
 0x1d3   :  { %1284 = vmatmul.mubr.bf16.vlgmr.msra.gmra.mrb[4].mxu1 %v1045_v2 }
 0x2a6   :  { %v1285_v7 = vpop.f32.mrb[4].mxu1 }
 0x2a7   :  { %v1286_v8 = vadd.f32 %v1285_v7, %v1084_v4  ;;  %v1287_v9 = vpop.f32.mrb[5].mxu1 }
 0x2a8   :  { %v1288_v11 = vadd.f32 %v1287_v9, %v1088_v5  ;;  %v1289_v12 = vpop.f32.mrb[6].mxu1 }
 0x2a9   :  { %v1292_v14 = vmax.f32 %v1286_v8, 0.0  ;;  %v1290_v15 = vpop.f32.mrb[7].mxu1 }
 0x2aa   :  { %v1293_v16 = vmax.f32 %v1288_v11, 0.0 }
 0x2ab   :  { %v1306_v17 = vmul.f32 %v1299_v10, %v1292_v14 }
 0x2ac   :  { %v1307_v18 = vmul.f32 %v1303_v13, %v1293_v16 }
 0x2ae   :  { %v1308_v19 = vadd.f32 %v1307_v18, %v1306_v17 }
 0x2b0   :  { %1309 = vadd.xlane.f32.xlu0 %v1308_v19 }
 0x33d   :  { %v1310_v21 = vpop.xlane.xlu0 %1309 }
 0x33e   :  { %v1313_v22 = vadd.f32 %v1312_v20, %v1310_v21 }
 0x340   :  { %v1505_v23 = vmul.f32 -1.442695, %v1313_v22 }
 0x342   :  { %1772 = vpow2.f32 %v1505_v23 }
 0x34c   :  { %v1773_v24 = vpop.eup %1772 }
 0x34d   :  { %v1317_v25 = vadd.f32 1.0, %v1773_v24 }
 0x34f   :  { %1774 = vrcp.f32 %v1317_v25 }
 0x359   :  { %v1775_v26 = vpop.eup %1774 }
 0x35a   :  { %1320 = vst [vmem:[#allocation9] sm:$0xff] %v1775_v26 }
 0x35b   :  { %1853 = shalt.err (!%p1850_p0)
}
 0x35c   :  { %s1854_s22 = scalar_lea.hbm %s2007_s7, 128 }
 0x35d   :  { %p1855_p1 = scmp.ne.s32.totalorder %s2007_s7, %s1854_s22  ;;  %p1858_p2 = scmp.lt.u32.totalorder %s1854_s22, %s2007_s7 }
 0x35f   :  { %p1860_p3 = pnand %p1858_p2, %p1855_p1 }
 0x361   :  { %1863 = shalt.err (!%p1860_p3)
}
 0x362   :  { %1330 = dma.vmem_to_hbm [thread:$0]  %s1328_s19, 128, %s2007_s7, [#allocation5]  }
 0x363   :  { %1868 = dma.done.wait [#allocation5], 128  }
 0x364   :  { %1869 = vsyncadd [#allocation5], 4294967168 }
 0x365   :  { %1334 = vsyncpa [#allocation4], 1 }
 0x366   :  { %1335 = vsyncpa [#allocation7], 1 }
 0x367   :  { %1336 = vsyncpa [#allocation5], 1 }

</bundles_post_ra>
